<compile_context>
chip_gen: v6e
topology: v6e:2x2x1
jax: 0.10.0
libtpu: 0.0.40
codegen_flags: <defaults>
</compile_context>

<pallas_src>
import jax
import jax.numpy as jnp
from jax.experimental import pallas as pl
from jax.experimental.pallas import tpu as pltpu

LANE = 128  # TPU lane width; hidden dims are zero-padded to a multiple of this


def _round_up(x, m):
    return ((x + m - 1) // m) * m


def mlp_kernel(x_ref, t_ref, scol_ref, w0x_ref, w0t_ref, b0_ref,
               w1_ref, b1_ref, wl_ref, bl_ref, out_ref):
    """Fused guide-model MLP for one batch tile.

    x_ref    : (TB, DS)  int8     x replicated across the S one-hot lanes
    t_ref    : (TB, 1)   float32  times
    scol_ref : (1,  DS)  int32    (iota % S), hoisted constant
    w0x_ref  : (DS, H0P) bfloat16 layer-0 weights for the one-hot part
    w0t_ref  : (1,  H0P) float32  layer-0 weight row for the time feature
    b0_ref   : (1,  H0P) float32
    w1_ref   : (H0P,H1P) bfloat16
    b1_ref   : (1,  H1P) float32
    wl_ref   : (1,  H1P) float32  final layer as a row vector
    bl_ref   : (1,  1)   float32
    out_ref  : (TB, 1)   float32
    """
    # ---- in-kernel one-hot: onehot[b, j] = (x[b, j // S] == j % S) ----------
    # Compare in int32 (robust on all generations), result kept f32 for the
    # v5e VALU; narrowed to bf16 only at the matmul boundary (lossless: 0/1).
    x_i32 = x_ref[...].astype(jnp.int32)                         # (TB, DS)
    onehot = (x_i32 == scol_ref[...]).astype(jnp.float32)        # (TB, DS)

    # ---- hidden layer 0: bf16 MXU matmul + rank-1 time update + bias, ReLU --
    # (dropout == identity in eval mode)
    h = jnp.dot(onehot.astype(jnp.bfloat16), w0x_ref[...],
                preferred_element_type=jnp.float32)              # (TB, H0P) f32
    h = h + t_ref[...] * w0t_ref[...] + b0_ref[...]
    h = jnp.maximum(h, 0.0)

    # ---- hidden layer 1 ------------------------------------------------------
    h = jnp.dot(h.astype(jnp.bfloat16), w1_ref[...],
                preferred_element_type=jnp.float32) + b1_ref[...]
    h = jnp.maximum(h, 0.0)

    # ---- output layer: elementwise h*wl + cross-lane (XLU) reduce -----------
    # Avoids an M=1 MXU push / h transpose; output is tiny (TB*4 bytes).
    out_ref[...] = jnp.sum(h * wl_ref[...], axis=1, keepdims=True) + bl_ref[...]


def _choose_tile_b(B, max_tile_b):
    # Multiple of 128 (also a multiple of the int8 sublane packing of 32);
    # sized so the batch grid has >= 2 "parallel" steps whenever B allows it
    # (v7x has 2 TensorCores sharing the grid).
    tb = min(max_tile_b, max(LANE, _round_up(pl.cdiv(B, 2), LANE)))
    return tb


def normal_predictor_forward(x, t, params, *, D, S, max_tile_b=1024,
                             vmem_limit_bytes=32 * 1024 * 1024):
    """Forward pass matching NormalPredictorGuideModel.forward (returns h.squeeze()).

    x      : (B, D) integer discrete states in [0, S)
    t      : (B,)   float32 times
    params : output of prepare_params(...) (lane-padded, split layer-0 weights)
    """
    assert S <= 127, "int8 replication requires S <= 127"
    B = x.shape[0]
    DS = D * S

    w0x, w0t, b0, w1, b1, wl_row, bl = params
    assert w0x.shape[0] == DS, "layer-0 weight rows must equal D * S"
    H0P, H1P = w0x.shape[1], w1.shape[1]

    tile_b = _choose_tile_b(B, max_tile_b)
    num_tiles = pl.cdiv(B, tile_b)
    B_pad = num_tiles * tile_b

    # Replicate x across the S one-hot lanes in the wrapper (removes the
    # in-kernel expand matmul); int8 keeps the DMA at DS bytes per row.
    x_rep = jnp.repeat(x.astype(jnp.int8), S, axis=1)              # (B, DS)
    x_p = jnp.zeros((B_pad, DS), jnp.int8).at[:B].set(x_rep)
    t_p = jnp.zeros((B_pad, 1), jnp.float32).at[:B, 0].set(t.astype(jnp.float32))

    # Hoisted constant: s_col[0, j] = j % S
    s_col = (jnp.arange(DS, dtype=jnp.int32) % S).reshape(1, DS)

    flops = 2 * B_pad * (DS * H0P + H0P * H1P + H1P)
    bytes_accessed = int(
        x_p.size + t_p.size * 4 + B_pad * 4 + s_col.size * 4
        + sum(p.size * p.dtype.itemsize for p in params))

    full = lambda a: pl.BlockSpec(a.shape, lambda i: (0, 0))  # VMEM-resident block

    out = pl.pallas_call(
        mlp_kernel,
        out_shape=jax.ShapeDtypeStruct((B_pad, 1), jnp.float32),
        grid=(num_tiles,),
        in_specs=[
            pl.BlockSpec((tile_b, DS), lambda i: (i, 0)),   # x_rep : batch-tiled
            pl.BlockSpec((tile_b, 1), lambda i: (i, 0)),    # t     : batch-tiled
            full(s_col),                                    # constants / weights
            full(w0x), full(w0t), full(b0),                 # stay VMEM-resident
            full(w1), full(b1),
            full(wl_row), full(bl),
        ],
        out_specs=pl.BlockSpec((tile_b, 1), lambda i: (i, 0)),
        compiler_params=pltpu.CompilerParams(
            dimension_semantics=("parallel",),   # independent batch tiles
            vmem_limit_bytes=vmem_limit_bytes,   # explicit budget, v7x-safe
        ),
        cost_estimate=pl.CostEstimate(
            flops=flops, transcendentals=0, bytes_accessed=bytes_accessed),
    )(x_p, t_p, s_col, w0x, w0t, b0, w1, b1, wl_row, bl)

    return out[:B, 0]  # h.squeeze() with output_layer_dim == 1


def _pad_to(arr, shape):
    out = jnp.zeros(shape, arr.dtype)
    return out.at[tuple(slice(0, s) for s in arr.shape)].set(arr)


def prepare_params(raw_params, *, D, S, stack_time=True, lane=LANE):
    """Split layer-0 into (one-hot, time) parts and zero-pad widths to `lane`.

    Matmul weights (w0x, w1) are stored bf16 (MXU operand dtype); biases, the
    time row and the final row stay f32 (elementwise / XLU path).  Zero
    padding is exact: padded lanes stay 0 through ReLU and never contribute.
    """
    w0, b0, w1, b1, wl, bl = raw_params        # transposed torch layout: (in,out)
    DS = D * S
    H0, H1 = w0.shape[1], w1.shape[1]
    H0P = max(lane, _round_up(H0, lane))
    H1P = max(lane, _round_up(H1, lane))

    w0x = w0[:DS]                              # (DS, H0)
    if stack_time:
        w0t = w0[DS:DS + 1]                    # (1, H0) -- time feature row
    else:
        w0t = jnp.zeros((1, H0), jnp.float32)  # rank-1 update contributes 0

    return (
        _pad_to(w0x, (DS, H0P)).astype(jnp.bfloat16),
        _pad_to(w0t, (1, H0P)),
        _pad_to(b0, (1, H0P)),
        _pad_to(w1, (H0P, H1P)).astype(jnp.bfloat16),
        _pad_to(b1, (1, H1P)),
        _pad_to(wl.T, (1, H1P)),               # wl: (H1, 1) -> row (1, H1)
        bl.reshape(1, 1).astype(jnp.float32),
    )


def init_params(key, input_dim, hidden_dims):
    """torch.nn.Linear-style uniform(-1/sqrt(fan_in), 1/sqrt(fan_in)) init."""
    params = []
    dims = [input_dim] + list(hidden_dims) + [1]
    for i in range(len(dims) - 1):
        fan_in, fan_out = dims[i], dims[i + 1]
        key, kw, kb = jax.random.split(key, 3)
        bound = 1.0 / jnp.sqrt(jnp.float32(fan_in))
        w = jax.random.uniform(kw, (fan_in, fan_out), jnp.float32, -bound, bound)
        b = jax.random.uniform(kb, (1, fan_out), jnp.float32, -bound, bound)
        params += [w, b]
    return tuple(params)


if __name__ == "__main__":
    # Small shapes consistent with the module: x is (B, D) discrete with S states.
    # B = 300 exercises two batch tiles (tile_b = 256 here) plus padding/masking.
    B, D, S = 300, 16, 8
    hidden_dims = [32, 32]
    stack_time = True
    input_dim = D * S + (1 if stack_time else 0)  # 129

    key = jax.random.PRNGKey(0)
    key, kx, kt, kp = jax.random.split(key, 4)

    x = jax.random.randint(kx, (B, D), 0, S, dtype=jnp.int32)
    t = jax.random.uniform(kt, (B,), jnp.float32)

    raw_params = init_params(kp, input_dim, hidden_dims)
    params = prepare_params(raw_params, D=D, S=S, stack_time=stack_time)

    y_pred = normal_predictor_forward(x, t, params, D=D, S=S)
    y_pred = jax.block_until_ready(y_pred)
    assert y_pred.shape == (B,)

    # --- references (plain JAX, no Pallas) -----------------------------------
    w0, b0, w1, b1, wl, bl = raw_params
    xt_enc = jax.nn.one_hot(x, S, dtype=jnp.float32).reshape(B, D * S)
    h_in = jnp.concatenate([xt_enc, t.reshape(-1, 1)], axis=-1)

    # (a) full-precision f32 reference (exact module semantics)
    h32 = jnp.maximum(h_in @ w0 + b0, 0.0)
    h32 = jnp.maximum(h32 @ w1 + b1, 0.0)
    y_f32 = (h32 @ wl + bl).reshape(B)

    # (b) bf16-matched reference (same matmul operand precision as the kernel)
    hb = jnp.dot(xt_enc.astype(jnp.bfloat16), w0[:D * S].astype(jnp.bfloat16),
                 preferred_element_type=jnp.float32)
    hb = jnp.maximum(hb + t.reshape(-1, 1) * w0[D * S:D * S + 1] + b0, 0.0)
    hb = jnp.maximum(jnp.dot(hb.astype(jnp.bfloat16), w1.astype(jnp.bfloat16),
                             preferred_element_type=jnp.float32) + b1, 0.0)
    y_bf16 = (hb @ wl + bl).reshape(B)

    err_bf16 = float(jnp.max(jnp.abs(y_pred - y_bf16)))
    err_f32 = float(jnp.max(jnp.abs(y_pred - y_f32)))
    assert jnp.allclose(y_pred, y_bf16, atol=1e-3, rtol=1e-3), err_bf16
    assert jnp.allclose(y_pred, y_f32, atol=2e-2, rtol=2e-2), err_f32

    print("KERNEL_OK")
</pallas_src>

<mosaic_0001>
module attributes {stable_mosaic.version = 11 : i64} {
  func.func @mlp_kernel(%arg0: i32, %arg1: memref<256x128xi8, #tpu.memory_space<vmem>>, %arg2: memref<256x1xf32, #tpu.memory_space<vmem>>, %arg3: memref<1x128xi32, #tpu.memory_space<vmem>>, %arg4: memref<128x128xbf16, #tpu.memory_space<vmem>>, %arg5: memref<1x128xf32, #tpu.memory_space<vmem>>, %arg6: memref<1x128xf32, #tpu.memory_space<vmem>>, %arg7: memref<128x128xbf16, #tpu.memory_space<vmem>>, %arg8: memref<1x128xf32, #tpu.memory_space<vmem>>, %arg9: memref<1x128xf32, #tpu.memory_space<vmem>>, %arg10: memref<1x1xf32, #tpu.memory_space<vmem>>, %arg11: memref<256x1xf32, #tpu.memory_space<vmem>>) attributes {dimension_semantics = [#tpu.dimension_semantics<parallel>], iteration_bounds = array<i64: 2>, scalar_prefetch = 0 : i64, scratch_operands = 0 : i64, tpu.core_type = #tpu.core_type<tc>, window_params = [{transform_indices = @transform_0, window_bounds = array<i64: 256, 128>}, {transform_indices = @transform_1, window_bounds = array<i64: 256, 1>}, {pipeline_mode = #tpu.pipeline_mode<synchronous>, transform_indices = @transform_2, window_bounds = array<i64: 1, 128>}, {pipeline_mode = #tpu.pipeline_mode<synchronous>, transform_indices = @transform_3, window_bounds = array<i64: 128, 128>}, {pipeline_mode = #tpu.pipeline_mode<synchronous>, transform_indices = @transform_4, window_bounds = array<i64: 1, 128>}, {pipeline_mode = #tpu.pipeline_mode<synchronous>, transform_indices = @transform_5, window_bounds = array<i64: 1, 128>}, {pipeline_mode = #tpu.pipeline_mode<synchronous>, transform_indices = @transform_6, window_bounds = array<i64: 128, 128>}, {pipeline_mode = #tpu.pipeline_mode<synchronous>, transform_indices = @transform_7, window_bounds = array<i64: 1, 128>}, {pipeline_mode = #tpu.pipeline_mode<synchronous>, transform_indices = @transform_8, window_bounds = array<i64: 1, 128>}, {pipeline_mode = #tpu.pipeline_mode<synchronous>, transform_indices = @transform_9, window_bounds = array<i64: 1, 1>}, {transform_indices = @transform_10, window_bounds = array<i64: 256, 1>}]} {
    %c0 = arith.constant 0 : index
    %c0_0 = arith.constant 0 : index
    %0 = vector.load %arg1[%c0, %c0_0] : memref<256x128xi8, #tpu.memory_space<vmem>>, vector<256x128xi8>
    %1 = arith.extsi %0 : vector<256x128xi8> to vector<256x128xi32>
    %c0_1 = arith.constant 0 : index
    %c0_2 = arith.constant 0 : index
    %2 = vector.load %arg3[%c0_1, %c0_2] : memref<1x128xi32, #tpu.memory_space<vmem>>, vector<1x128xi32>
    %3 = vector.broadcast %2 : vector<1x128xi32> to vector<256x128xi32>
    %4 = arith.cmpi eq, %1, %3 : vector<256x128xi32>
    %5 = arith.extui %4 : vector<256x128xi1> to vector<256x128xi32>
    %6 = arith.sitofp %5 : vector<256x128xi32> to vector<256x128xf32>
    %7 = arith.truncf %6 : vector<256x128xf32> to vector<256x128xbf16>
    %c0_3 = arith.constant 0 : index
    %c0_4 = arith.constant 0 : index
    %8 = vector.load %arg4[%c0_3, %c0_4] : memref<128x128xbf16, #tpu.memory_space<vmem>>, vector<128x128xbf16>
    %cst = arith.constant dense<0.000000e+00> : vector<256x128xf32>
    %9 = tpu.matmul %7, %8, %cst {dimension_numbers = #tpu.dot_dimension_numbers<[1], [0], [0], [1], [0, 0, 1, 1], [], []>} : vector<256x128xbf16>, vector<128x128xbf16>, vector<256x128xf32> -> vector<256x128xf32>
    %c0_5 = arith.constant 0 : index
    %c0_6 = arith.constant 0 : index
    %10 = vector.load %arg2[%c0_5, %c0_6] : memref<256x1xf32, #tpu.memory_space<vmem>>, vector<256x1xf32>
    %c0_7 = arith.constant 0 : index
    %c0_8 = arith.constant 0 : index
    %11 = vector.load %arg5[%c0_7, %c0_8] : memref<1x128xf32, #tpu.memory_space<vmem>>, vector<1x128xf32>
    %12 = vector.broadcast %10 : vector<256x1xf32> to vector<256x128xf32>
    %13 = vector.broadcast %11 : vector<1x128xf32> to vector<256x128xf32>
    %14 = arith.mulf %12, %13 : vector<256x128xf32>
    %15 = arith.addf %9, %14 : vector<256x128xf32>
    %c0_9 = arith.constant 0 : index
    %c0_10 = arith.constant 0 : index
    %16 = vector.load %arg6[%c0_9, %c0_10] : memref<1x128xf32, #tpu.memory_space<vmem>>, vector<1x128xf32>
    %17 = vector.broadcast %16 : vector<1x128xf32> to vector<256x128xf32>
    %18 = arith.addf %15, %17 : vector<256x128xf32>
    %cst_11 = arith.constant 0.000000e+00 : f32
    %19 = vector.broadcast %cst_11 : f32 to vector<256x128xf32>
    %20 = arith.maximumf %18, %19 : vector<256x128xf32>
    %21 = arith.truncf %20 : vector<256x128xf32> to vector<256x128xbf16>
    %c0_12 = arith.constant 0 : index
    %c0_13 = arith.constant 0 : index
    %22 = vector.load %arg7[%c0_12, %c0_13] : memref<128x128xbf16, #tpu.memory_space<vmem>>, vector<128x128xbf16>
    %cst_14 = arith.constant dense<0.000000e+00> : vector<256x128xf32>
    %23 = tpu.matmul %21, %22, %cst_14 {dimension_numbers = #tpu.dot_dimension_numbers<[1], [0], [0], [1], [0, 0, 1, 1], [], []>} : vector<256x128xbf16>, vector<128x128xbf16>, vector<256x128xf32> -> vector<256x128xf32>
    %c0_15 = arith.constant 0 : index
    %c0_16 = arith.constant 0 : index
    %24 = vector.load %arg8[%c0_15, %c0_16] : memref<1x128xf32, #tpu.memory_space<vmem>>, vector<1x128xf32>
    %25 = vector.broadcast %24 : vector<1x128xf32> to vector<256x128xf32>
    %26 = arith.addf %23, %25 : vector<256x128xf32>
    %cst_17 = arith.constant 0.000000e+00 : f32
    %27 = vector.broadcast %cst_17 : f32 to vector<256x128xf32>
    %28 = arith.maximumf %26, %27 : vector<256x128xf32>
    %c0_18 = arith.constant 0 : index
    %c0_19 = arith.constant 0 : index
    %29 = vector.load %arg9[%c0_18, %c0_19] : memref<1x128xf32, #tpu.memory_space<vmem>>, vector<1x128xf32>
    %30 = vector.broadcast %29 : vector<1x128xf32> to vector<256x128xf32>
    %31 = arith.mulf %28, %30 : vector<256x128xf32>
    %cst_20 = arith.constant dense<0.000000e+00> : vector<256xf32>
    %32 = vector.multi_reduction <add>, %31, %cst_20 [1] : vector<256x128xf32> to vector<256xf32>
    %33 = vector.shape_cast %32 : vector<256xf32> to vector<256x1xf32>
    %c0_21 = arith.constant 0 : index
    %c0_22 = arith.constant 0 : index
    %34 = vector.load %arg10[%c0_21, %c0_22] : memref<1x1xf32, #tpu.memory_space<vmem>>, vector<1x1xf32>
    %35 = vector.broadcast %34 : vector<1x1xf32> to vector<256x1xf32>
    %36 = arith.addf %33, %35 : vector<256x1xf32>
    %c0_23 = arith.constant 0 : index
    %c0_24 = arith.constant 0 : index
    %37 = vector.load %arg11[%c0_23, %c0_24] : memref<256x1xf32, #tpu.memory_space<vmem>>, vector<256x1xf32>
    tpu.vector_store %arg11[%c0_23, %c0_24], %36 {strides = array<i32>} : memref<256x1xf32, #tpu.memory_space<vmem>>, vector<256x1xf32>,
    return
  }
  func.func @transform_0(%arg0: i32) -> (i32, i32) {
    %c0_i32 = arith.constant 0 : i32
    %c0_i32_0 = arith.constant 0 : i32
    return %arg0, %c0_i32 : i32, i32
  }
  func.func @transform_1(%arg0: i32) -> (i32, i32) {
    %c0_i32 = arith.constant 0 : i32
    %c0_i32_0 = arith.constant 0 : i32
    return %arg0, %c0_i32 : i32, i32
  }
  func.func @transform_2(%arg0: i32) -> (i32, i32) {
    %c0_i32 = arith.constant 0 : i32
    %c0_i32_0 = arith.constant 0 : i32
    %c0_i32_1 = arith.constant 0 : i32
    return %c0_i32, %c0_i32_0 : i32, i32
  }
  func.func @transform_3(%arg0: i32) -> (i32, i32) {
    %c0_i32 = arith.constant 0 : i32
    %c0_i32_0 = arith.constant 0 : i32
    %c0_i32_1 = arith.constant 0 : i32
    return %c0_i32, %c0_i32_0 : i32, i32
  }
  func.func @transform_4(%arg0: i32) -> (i32, i32) {
    %c0_i32 = arith.constant 0 : i32
    %c0_i32_0 = arith.constant 0 : i32
    %c0_i32_1 = arith.constant 0 : i32
    return %c0_i32, %c0_i32_0 : i32, i32
  }
  func.func @transform_5(%arg0: i32) -> (i32, i32) {
    %c0_i32 = arith.constant 0 : i32
    %c0_i32_0 = arith.constant 0 : i32
    %c0_i32_1 = arith.constant 0 : i32
    return %c0_i32, %c0_i32_0 : i32, i32
  }
  func.func @transform_6(%arg0: i32) -> (i32, i32) {
    %c0_i32 = arith.constant 0 : i32
    %c0_i32_0 = arith.constant 0 : i32
    %c0_i32_1 = arith.constant 0 : i32
    return %c0_i32, %c0_i32_0 : i32, i32
  }
  func.func @transform_7(%arg0: i32) -> (i32, i32) {
    %c0_i32 = arith.constant 0 : i32
    %c0_i32_0 = arith.constant 0 : i32
    %c0_i32_1 = arith.constant 0 : i32
    return %c0_i32, %c0_i32_0 : i32, i32
  }
  func.func @transform_8(%arg0: i32) -> (i32, i32) {
    %c0_i32 = arith.constant 0 : i32
    %c0_i32_0 = arith.constant 0 : i32
    %c0_i32_1 = arith.constant 0 : i32
    return %c0_i32, %c0_i32_0 : i32, i32
  }
  func.func @transform_9(%arg0: i32) -> (i32, i32) {
    %c0_i32 = arith.constant 0 : i32
    %c0_i32_0 = arith.constant 0 : i32
    %c0_i32_1 = arith.constant 0 : i32
    return %c0_i32, %c0_i32_0 : i32, i32
  }
  func.func @transform_10(%arg0: i32) -> (i32, i32) {
    %c0_i32 = arith.constant 0 : i32
    %c0_i32_0 = arith.constant 0 : i32
    return %arg0, %c0_i32 : i32, i32
  }
}

</mosaic_0001>

<bundles_post_ra>
// kernel: tpu_custom_call.1
= control target key start
LH: loop header
LB: loop body
LE: loop exit
PB: predicated region body
PF: predicated region fallthrough
CT: control target
= control target key end

     0   :  { %s1934_s15 = smov 0   ;;  %s2531_s0 = inlined_call_operand.vmem [shape: s8[512,128], index: 0, kind: input, shape index: {}]   ;;  %s2532_s1 = inlined_call_operand.vmem [shape: f32[512,1], index: 1, kind: input, shape index: {}]   ;;  %s2533_s2 = inlined_call_operand.vmem [shape: s32[1,128], index: 2, kind: input, shape index: {}]   ;;  %s2534_s3 = inlined_call_operand.vmem [shape: bf16[128,128], index: 3, kind: input, shape index: {}]   ;;  %s2535_s4 = inlined_call_operand.vmem [shape: f32[1,128], index: 4, kind: input, shape index: {}]   ;;  %s2536_s5 = inlined_call_operand.vmem [shape: f32[1,128], index: 5, kind: input, shape index: {}]   ;;  %s2537_s6 = inlined_call_operand.vmem [shape: bf16[128,128], index: 6, kind: input, shape index: {}]   ;;  %s2538_s7 = inlined_call_operand.vmem [shape: f32[1,128], index: 7, kind: input, shape index: {}]   ;;  %s2539_s8 = inlined_call_operand.vmem [shape: f32[1,128], index: 8, kind: input, shape index: {}]   ;;  %s2540_s9 = inlined_call_operand.<no memory space> [shape: f32[1,1], index: 9, kind: input, shape index: {}]   ;;  %s2541_s10 = inlined_call_operand.vmem [shape: f32[512,1], index: 10, kind: output, shape index: {}]  }
   0x1   :  { %v15_v0 = vstv %s2540_s9 }
   0x2   :  { %16 = vst [vmem:[#allocation2] sm:$0x1] %v15_v0 }
   0x3 LB: > { %s1595_s16 = sadd.s32 4294967295, %s1872_s15   ;;  %p1599_p0 = scmp.ge.s32.totalorder %s1872_s15, 1  ;;  %s1872_s15 = sphi %s1934_s15, %s22_s15  }
   0x4   : > { %p326_p1 = scmp.lt.s32.totalorder %s1872_s15, 3 }
   0x6   : > { %p327_p2 = pnand %p1599_p0, %p326_p1 }
   0x7   : > { %s1600_s9 = sshll.u32 (!%p327_p2), %s1595_s16, 3  ;;  %s1602_s23 = sshll.u32 (!%p327_p2), %s1595_s16, 5 }
   0x8   : > { %330 = sbr.rel (%p327_p2) target bundleno = 660 (0x294), region = 60  ;;  %p370_p3 = scmp.lt.s32.totalorder (!%p327_p2), %s1600_s9, 15 }
   0x9   : > { %p376_p4 = scmp.lt.s32.totalorder (!%p327_p2), %s1602_s23, 63 }
   0xd   : > { %v1850_v1 = vld [vmem:[%s2534_s3 + $0x38] sm:$0xff]   ;;  %v1851_v2 = vld [vmem:[%s2534_s3 + $0x30] sm:$0xff]   ;;  %s2591_s9 = smov (!%p370_p3, %s1600_s9), 15  ;;  %v1874_v3 = vmov 0   ;;  %v1852_v4 = vld [vmem:[%s2534_s3 + $0x28] sm:$0xff]   ;;  %s2593_s23 = smov (!%p376_p4, %s1602_s23), 63 }
   0xe   : > { %1742 = vmatprep.subr.bf16.mxu0 %v1850_v1  ;;  %1848 = vset.pattern.permute.xlu0 %v1874_v3  ;;  %s1601_s24 = sshll.u32 %s2591_s9, 3  ;;  %v1853_v5 = vld [vmem:[%s2534_s3 + $0x20] sm:$0xff]   ;;  %v1854_v10 = vld [vmem:[%s2534_s3 + $0x18] sm:$0xff]   ;;  %s1603_s14 = sshll.u32 %s2593_s23, 3  ;;  %v1875_v11 = vmov 1.0|1.0  }
   0xf   : > { %1743 = vmatpush3.bf16.msra.mxu0 %v1850_v1  ;;  %1849 = vset.pattern.permute.xlu1 %v1874_v3  ;;  %s1954_s27 = scalar_lea.vmem %s2531_s0, %s1601_s24  ;;  %v1963_v7 = vld [vmem:[%s2533_s2] ss:$0 sm:$0xff]  ;;  %s1978_s18 = scalar_lea.vmem %s2532_s1, %s1603_s14  ;;  %v1855_v16 = vld [vmem:[%s2534_s3 + $0x10] sm:$0xff]   ;;  %v1856_v23 = vld [vmem:[%s2534_s3 + $0x8] sm:$0xff]  }
  0x10   : > { %1744 = vmatprep.subr.bf16.mxu0 %v1851_v2  ;;  %v388_v6 = vld [vmem:[%s1954_s27] sm:$0xff]  ;;  %v563_v13 = vld [vmem:[%s1978_s18 + $0x10] sm:$0xff]  ;;  %v562_v14 = vld [vmem:[%s1978_s18 + $0x8] sm:$0xff] }
  0x11   : > { %v396_v8 = vunpack.c.0.s8 %v388_v6  ;;  %v397_v9 = vunpack.c.1.s8 %v388_v6  ;;  %v561_v12 = vld [vmem:[%s1978_s18] sm:$0xff]  ;;  %606 = vperm.xlu1 %1849, %v563_v13   ;;  %v564_v15 = vld [vmem:[%s1978_s18 + $0x18] sm:$0xff]  ;;  %v398_v17 = vunpack.c.2.s8 %v388_v6  ;;  %v399_v18 = vunpack.c.3.s8 %v388_v6  ;;  %v389_v19 = vld [vmem:[%s1954_s27 + $0x8] sm:$0xff] }
  0x12   : > { %596 = vperm.xlu0 %1848, %v561_v12   ;;  %v565_v20 = vld [vmem:[%s1978_s18 + $0x20] sm:$0xff]  ;;  %v566_v21 = vld [vmem:[%s1978_s18 + $0x28] sm:$0xff]  ;;  %v395_v22 = vld [vmem:[%s1954_s27 + $0x38] sm:$0xff]  ;;  %v400_v26 = vunpack.c.0.s8 %v389_v19  ;;  %v401_v27 = vunpack.c.1.s8 %v389_v19  ;;  %v402_v46 = vunpack.c.2.s8 %v389_v19  ;;  %v403_v47 = vunpack.c.3.s8 %v389_v19 }
  0x13   : > { %1745 = vmatpush3.bf16.msra.mxu0 %v1851_v2  ;;  %vm433_vm0 = vcmp.eq.s32.totalorder %v396_v8, %v1963_v7  ;;  %vm434_vm1 = vcmp.eq.s32.totalorder %v397_v9, %v1963_v7  ;;  %vm1996_vm3 = vcmp.eq.s32.totalorder %v398_v17, %v1963_v7  ;;  %vm2001_vm4 = vcmp.eq.s32.totalorder %v399_v18, %v1963_v7  ;;  %v567_v32 = vld [vmem:[%s1978_s18 + $0x30] sm:$0xff]  ;;  %v568_v33 = vld [vmem:[%s1978_s18 + $0x38] sm:$0xff]  ;;  %v1857_v34 = vld [vmem:[%s2534_s3] sm:$0xff]  }
  0x14   : > { %1746 = vmatprep.subr.bf16.mxu0 %v1852_v4  ;;  %vm1648_vm2 = vmpackc.low %vm434_vm1, %vm433_vm0  ;;  %v424_v28 = vunpack.c.0.s8 %v395_v22  ;;  %v425_v29 = vunpack.c.1.s8 %v395_v22  ;;  %v426_v30 = vunpack.c.2.s8 %v395_v22  ;;  %v427_v31 = vunpack.c.3.s8 %v395_v22  ;;  %v569_v41 = vld [vmem:[%s1978_s18 + $0x40] sm:$0xff]  ;;  %v570_v42 = vld [vmem:[%s1978_s18 + $0x48] sm:$0xff] }
  0x15   : > { %1758 = vmatprep.mubr.msk.bf16.mxu0 %vm1648_vm2, %v1875_v11  ;;  %611 = vperm.xlu1 %1849, %v564_v15   ;;  %vm1650_vm9 = vmpackc.low %vm2001_vm4, %vm1996_vm3  ;;  %vm2035_vm10 = vcmp.eq.s32.totalorder %v400_v26, %v1963_v7  ;;  %vm2040_vm11 = vcmp.eq.s32.totalorder %v401_v27, %v1963_v7  ;;  %v390_v43 = vld [vmem:[%s1954_s27 + $0x10] sm:$0xff]  ;;  %v572_v45 = vld [vmem:[%s1978_s18 + $0x58] sm:$0xff]  ;;  %vm2070_vm15 = vcmp.eq.s32.totalorder %v402_v46, %v1963_v7 }
  0x16   : > { %601 = vperm.xlu0 %1848, %v562_v14   ;;  %vm2011_vm5 = vcmp.eq.s32.totalorder %v424_v28, %v1963_v7  ;;  %vm2016_vm6 = vcmp.eq.s32.totalorder %v425_v29, %v1963_v7  ;;  %vm2021_vm7 = vcmp.eq.s32.totalorder %v426_v30, %v1963_v7  ;;  %vm2026_vm8 = vcmp.eq.s32.totalorder %v427_v31, %v1963_v7  ;;  %vm1652_vm14 = vmpackc.low %vm2040_vm11, %vm2035_vm10  ;;  %v571_v44 = vld [vmem:[%s1978_s18 + $0x50] sm:$0xff]  ;;  %v573_v50 = vld [vmem:[%s1978_s18 + $0x60] sm:$0xff] }
  0x17   : > { %1747 = vmatpush3.bf16.msra.mxu0 %v1852_v4  ;;  %vm1676_vm12 = vmpackc.low %vm2016_vm6, %vm2011_vm5  ;;  %v404_v48 = vunpack.c.0.s8 %v390_v43  ;;  %v405_v49 = vunpack.c.1.s8 %v390_v43  ;;  %vm2075_vm0 = vcmp.eq.s32.totalorder %v403_v47, %v1963_v7  ;;  %v574_v53 = vld [vmem:[%s1978_s18 + $0x68] sm:$0xff]  ;;  %v391_v55 = vld [vmem:[%s1954_s27 + $0x18] sm:$0xff]  ;;  %v406_v57 = vunpack.c.2.s8 %v390_v43 }
  0x18   : > { %1748 = vmatprep.subr.bf16.mxu0 %v1853_v5  ;;  %vm1678_vm13 = vmpackc.low %vm2026_vm8, %vm2021_vm7  ;;  %v575_v56 = vld [vmem:[%s1978_s18 + $0x70] sm:$0xff]  ;;  %v407_v58 = vunpack.c.3.s8 %v390_v43  ;;  %v576_v59 = vld [vmem:[%s1978_s18 + $0x78] sm:$0xff]  ;;  %v408_v60 = vunpack.c.0.s8 %v391_v55  ;;  %v409_v61 = vunpack.c.1.s8 %v391_v55  ;;  %v411_v6 = vunpack.c.3.s8 %v391_v55 }
  0x19   : > { %621 = vperm.xlu1 %1849, %v566_v21   ;;  %vm2081_vm1 = vcmp.eq.s32.totalorder %v404_v48, %v1963_v7  ;;  %vm442_vm2 = vcmp.eq.s32.totalorder %v405_v49, %v1963_v7  ;;  %vm1654_vm3 = vmpackc.low %vm2075_vm0, %vm2070_vm15  ;;  %v577_v62 = vld [vmem:[%s1978_s18 + $0x80] sm:$0xff]  ;;  %v578_v1 = vld [vmem:[%s1978_s18 + $0x88] sm:$0xff]  ;;  %vm1494_vm5 = vcmask 7168  }
  0x1a   : > { %616 = vperm.xlu0 %1848, %v565_v20   ;;  %vm1656_vm4 = vmpackc.low %vm442_vm2, %vm2081_vm1  ;;  %vm2104_vm10 = vcmp.eq.s32.totalorder %v407_v58, %v1963_v7  ;;  %vm2110_vm11 = vcmp.eq.s32.totalorder %v408_v60, %v1963_v7  ;;  %v392_v3 = vld [vmem:[%s1954_s27 + $0x20] sm:$0xff]  ;;  %v579_v4 = vld [vmem:[%s1978_s18 + $0x90] sm:$0xff]  ;;  %vm2136_vm2 = vcmp.eq.s32.totalorder %v411_v6, %v1963_v7 }
  0x1b   : > { %1749 = vmatpush3.bf16.msra.mxu0 %v1853_v5  ;;  %v410_v5 = vunpack.c.2.s8 %v391_v55  ;;  %v580_v8 = vld [vmem:[%s1978_s18 + $0x98] sm:$0xff]  ;;  %v412_v9 = vunpack.c.0.s8 %v392_v3  ;;  %v581_v12 = vld [vmem:[%s1978_s18 + $0xa0] sm:$0xff]  ;;  %v393_v19 = vld [vmem:[%s1954_s27 + $0x28] sm:$0xff]  ;;  %v414_v22 = vunpack.c.2.s8 %v392_v3 }
  0x1c   : > { %1750 = vmatprep.subr.bf16.mxu0 %v1854_v10  ;;  %v1858_v13 = vld [vmem:[%s2537_s6 + $0x38] sm:$0xff]   ;;  %v583_v20 = vld [vmem:[%s1978_s18 + $0xb0] sm:$0xff]  ;;  %v416_v25 = vunpack.c.0.s8 %v393_v19  ;;  %v417_v26 = vunpack.c.1.s8 %v393_v19  ;;  %v585_v27 = vld [vmem:[%s1978_s18 + $0xc0] sm:$0xff] }
  0x1d   : > { %631 = vperm.xlu1 %1849, %v568_v33   ;;  %vm2131_vm1 = vcmp.eq.s32.totalorder %v410_v5, %v1963_v7  ;;  %1790 = vmatprep.subr.bf16.mxu1 %v1858_v13  ;;  %v1859_v21 = vld [vmem:[%s2537_s6 + $0x30] sm:$0xff]   ;;  %v584_v24 = vld [vmem:[%s1978_s18 + $0xb8] sm:$0xff]  ;;  %v1860_v28 = vld [vmem:[%s2537_s6 + $0x28] sm:$0xff]  }
  0x1e   : > { %626 = vperm.xlu0 %1848, %v567_v32   ;;  %1791 = vmatpush3.bf16.msra.mxu1 %v1858_v13  ;;  %v586_v31 = vld [vmem:[%s1978_s18 + $0xc8] sm:$0xff]  ;;  %v587_v39 = vld [vmem:[%s1978_s18 + $0xd0] sm:$0xff]  ;;  %v1861_v40 = vld [vmem:[%s2537_s6 + $0x20] sm:$0xff]  }
  0x1f   : > { %1751 = vmatpush3.bf16.msra.mxu0 %v1854_v10  ;;  %v413_v10 = vunpack.c.1.s8 %v392_v3  ;;  %1792 = vmatprep.subr.bf16.mxu1 %v1859_v21  ;;  %v588_v43 = vld [vmem:[%s1978_s18 + $0xd8] sm:$0xff]  ;;  %v589_v46 = vld [vmem:[%s1978_s18 + $0xe0] sm:$0xff]  ;;  %v591_v51 = vld [vmem:[%s1978_s18 + $0xf0] sm:$0xff] }
  0x20   : > { %1752 = vmatprep.subr.bf16.mxu0 %v1855_v16  ;;  %v1862_v47 = vld [vmem:[%s2537_s6 + $0x18] sm:$0xff]   ;;  %v1864_v36 = vld [vmem:[%s2537_s6 + $0x8] sm:$0xff]   ;;  %v1865_v35 = vld [vmem:[%s2537_s6] sm:$0xff]  }
  0x21   : > { %641 = vperm.xlu1 %1849, %v570_v42   ;;  %v419_v42 = vunpack.c.3.s8 %v393_v19  ;;  %v592_v54 = vld [vmem:[%s1978_s18 + $0xf8] sm:$0xff]  ;;  %v2262_v0 = vld [vmem:[%s2535_s4] ss:$0 sm:$0xff] }
  0x22   : > { %636 = vperm.xlu0 %1848, %v569_v41   ;;  %1793 = vmatpush3.bf16.msra.mxu1 %v1859_v21  ;;  %v418_v41 = vunpack.c.2.s8 %v393_v19  ;;  %v2275_v14 = vld [vmem:[%s2536_s5] ss:$0 sm:$0xff] }
  0x23   : > { %1753 = vmatpush3.bf16.msra.mxu0 %v1855_v16  ;;  %v582_v16 = vld [vmem:[%s1978_s18 + $0xa8] sm:$0xff]  ;;  %1794 = vmatprep.subr.bf16.mxu1 %v1860_v28 }
  0x24   : > { %1754 = vmatprep.subr.bf16.mxu0 %v1856_v23 }
  0x25   : > { %651 = vperm.xlu1 %1849, %v572_v45  }
  0x26   : > { %646 = vperm.xlu0 %1848, %v571_v44   ;;  %1795 = vmatpush3.bf16.msra.mxu1 %v1860_v28 }
  0x27   : > { %1755 = vmatpush3.bf16.msra.mxu0 %v1856_v23  ;;  %v415_v23 = vunpack.c.3.s8 %v392_v3  ;;  %1796 = vmatprep.subr.bf16.mxu1 %v1861_v40 }
  0x28   : > { %1756 = vmatprep.subr.bf16.mxu0 %v1857_v34 }
  0x29   : > { %661 = vperm.xlu1 %1849, %v574_v53  }
  0x2a   : > { %656 = vperm.xlu0 %1848, %v573_v50   ;;  %v590_v50 = vld [vmem:[%s1978_s18 + $0xe8] sm:$0xff]  ;;  %1797 = vmatpush3.bf16.msra.mxu1 %v1861_v40 }
  0x2b   : > { %1757 = vmatpush3.bf16.msra.mxu0 %v1857_v34  ;;  %v394_v34 = vld [vmem:[%s1954_s27 + $0x30] sm:$0xff]  ;;  %1798 = vmatprep.subr.bf16.mxu1 %v1862_v47  ;;  %s2430_s27 = scalar_lea.vmem %s2541_s10, %s1603_s14 }
  0x2c   : > { %v420_v44 = vunpack.c.0.s8 %v394_v34  ;;  %v421_v45 = vunpack.c.1.s8 %v394_v34  ;;  %v422_v52 = vunpack.c.2.s8 %v394_v34  ;;  %v423_v53 = vunpack.c.3.s8 %v394_v34 }
  0x2d   : > { %671 = vperm.xlu1 %1849, %v576_v59  }
  0x2e   : > { %1759 = vmatmul.mubr.msk.bf16.vlgmr.msra.gmra.mxu0 %vm1650_vm9, %v1875_v11  ;;  %666 = vperm.xlu0 %1848, %v575_v56   ;;  %vm2099_vm9 = vcmp.eq.s32.totalorder %v406_v57, %v1963_v7 }
  0x2f   : > { %1762 = vmatprep.mubr.msk.bf16.mxu0 %vm1652_vm14, %v1875_v11  ;;  %vm446_vm14 = vcmp.eq.s32.totalorder %v409_v61, %v1963_v7  ;;  %vm1658_vm15 = vmpackc.low %vm2104_vm10, %vm2099_vm9  ;;  %1799 = vmatpush3.bf16.msra.mxu1 %v1862_v47 }
  0x30   : > { %vm1660_vm0 = vmpackc.low %vm446_vm14, %vm2110_vm11  ;;  %vm2172_vm11 = vcmp.eq.s32.totalorder %v414_v22, %v1963_v7  ;;  %vm2177_vm14 = vcmp.eq.s32.totalorder %v415_v23, %v1963_v7 }
  0x31   : > { %681 = vperm.xlu1 %1849, %v578_v1   ;;  %vm1662_vm9 = vmpackc.low %vm2136_vm2, %vm2131_vm1 }
  0x32   : > { %676 = vperm.xlu0 %1848, %v577_v62   ;;  %vm1666_vm1 = vmpackc.low %vm2177_vm14, %vm2172_vm11 }
  0x35   : > { %691 = vperm.xlu1 %1849, %v580_v8  }
  0x36   : > { %1763 = vmatmul.mubr.msk.bf16.gmra.mxu0 %vm1654_vm3, %v1875_v11  ;;  %686 = vperm.xlu0 %1848, %v579_v4   ;;  %vm2142_vm3 = vcmp.eq.s32.totalorder %v412_v9, %v1963_v7 }
  0x37   : > { %1766 = vmatprep.mubr.msk.bf16.mxu0 %vm1656_vm4, %v1875_v11  ;;  %vm2147_vm4 = vcmp.eq.s32.totalorder %v413_v10, %v1963_v7 }
  0x38   : > { %vm1664_vm10 = vmpackc.low %vm2147_vm4, %vm2142_vm3  ;;  %vm2213_vm3 = vcmp.eq.s32.totalorder %v418_v41, %v1963_v7  ;;  %vm2218_vm4 = vcmp.eq.s32.totalorder %v419_v42, %v1963_v7 }
  0x39   : > { %701 = vperm.xlu1 %1849, %v582_v16   ;;  %vm1670_vm11 = vmpackc.low %vm2218_vm4, %vm2213_vm3 }
  0x3a   : > { %696 = vperm.xlu0 %1848, %v581_v12  }
  0x3d   : > { %711 = vperm.xlu1 %1849, %v584_v24  }
  0x3e   : > { %1767 = vmatmul.mubr.msk.bf16.gmra.mxu0 %vm1658_vm15, %v1875_v11  ;;  %706 = vperm.xlu0 %1848, %v583_v20   ;;  %vm2183_vm15 = vcmp.eq.s32.totalorder %v416_v25, %v1963_v7 }
  0x3f   : > { %1770 = vmatprep.mubr.msk.bf16.mxu0 %vm1660_vm0, %v1875_v11  ;;  %vm2188_vm0 = vcmp.eq.s32.totalorder %v417_v26, %v1963_v7 }
  0x40   : > { %vm1668_vm2 = vmpackc.low %vm2188_vm0, %vm2183_vm15  ;;  %vm459_vm15 = vcmp.eq.s32.totalorder %v422_v52, %v1963_v7  ;;  %vm460_vm0 = vcmp.eq.s32.totalorder %v423_v53, %v1963_v7 }
  0x41   : > { %721 = vperm.xlu1 %1849, %v586_v31  }
  0x42   : > { %716 = vperm.xlu0 %1848, %v585_v27  }
  0x45   : > { %731 = vperm.xlu1 %1849, %v588_v43  }
  0x46   : > { %1771 = vmatmul.mubr.msk.bf16.gmra.mxu0 %vm1662_vm9, %v1875_v11  ;;  %726 = vperm.xlu0 %1848, %v587_v39   ;;  %vm457_vm9 = vcmp.eq.s32.totalorder %v420_v44, %v1963_v7 }
  0x47   : > { %1774 = vmatprep.mubr.msk.bf16.mxu0 %vm1664_vm10, %v1875_v11  ;;  %vm458_vm10 = vcmp.eq.s32.totalorder %v421_v45, %v1963_v7  ;;  %v1863_v7 = vld [vmem:[%s2537_s6 + $0x10] sm:$0xff]  }
  0x48   : > { %vm1672_vm14 = vmpackc.low %vm458_vm10, %vm457_vm9  ;;  %1800 = vmatprep.subr.bf16.mxu1 %v1863_v7 }
  0x49   : > { %741 = vperm.xlu1 %1849, %v590_v50   ;;  %1801 = vmatpush3.bf16.msra.mxu1 %v1863_v7 }
  0x4a   : > { %736 = vperm.xlu0 %1848, %v589_v46   ;;  %1802 = vmatprep.subr.bf16.mxu1 %v1864_v36 }
  0x4d   : > { %751 = vperm.xlu1 %1849, %v592_v54   ;;  %1803 = vmatpush3.bf16.msra.mxu1 %v1864_v36 }
  0x4e   : > { %1775 = vmatmul.mubr.msk.bf16.gmra.mxu0 %vm1666_vm1, %v1875_v11  ;;  %746 = vperm.xlu0 %1848, %v591_v51   ;;  %vm1674_vm1 = vmpackc.low %vm460_vm0, %vm459_vm15 }
  0x4f   : > { %1778 = vmatprep.mubr.msk.bf16.mxu0 %vm1668_vm2, %v1875_v11  ;;  %1804 = vmatprep.subr.bf16.mxu1 %v1865_v35 }
  0x51   : > { %1805 = vmatpush3.bf16.msra.mxu1 %v1865_v35 }
  0x56   : > { %1779 = vmatmul.mubr.msk.bf16.gmra.mxu0 %vm1670_vm11, %v1875_v11 }
  0x57   : > { %1782 = vmatprep.mubr.msk.bf16.mxu0 %vm1672_vm14, %v1875_v11 }
  0x5e   : > { %1783 = vmatmul.mubr.msk.bf16.gmra.mxu0 %vm1674_vm1, %v1875_v11 }
  0x5f   : > { %1786 = vmatprep.mubr.msk.bf16.mxu0 %vm1676_vm12, %v1875_v11 }
  0x66   : > { %1787 = vmatmul.mubr.msk.bf16.gmra.mxu0 %vm1678_vm13, %v1875_v11 }
  0x8c   : > { %v607_v11 = vpop.permute.xlu1 %606 }
  0x8d   : > { %v597_v37 = vpop.permute.xlu0 %596  ;;  %v762_v2 = vmul.f32 %v2262_v0, %v607_v11 }
  0x8e   : > { %v760_v1 = vmul.f32 %v2262_v0, %v597_v37 }
  0x90   : > { %v612_v55 = vpop.permute.xlu1 %611 }
  0x91   : > { %v602_v38 = vpop.permute.xlu0 %601  ;;  %v763_v4 = vmul.f32 %v2262_v0, %v612_v55 }
  0x92   : > { %v761_v13 = vmul.f32 %v2262_v0, %v602_v38 }
  0x94   : > { %v622_v57 = vpop.permute.xlu1 %621 }
  0x95   : > { %v617_v56 = vpop.permute.xlu0 %616  ;;  %v765_v40 = vmul.f32 %v2262_v0, %v622_v57 }
  0x96   : > { %v764_v24 = vmul.f32 %v2262_v0, %v617_v56 }
  0x98   : > { %v632_v59 = vpop.permute.xlu1 %631 }
  0x99   : > { %v627_v58 = vpop.permute.xlu0 %626  ;;  %v767_v29 = vmul.f32 %v2262_v0, %v632_v59 }
  0x9a   : > { %v766_v26 = vmul.f32 %v2262_v0, %v627_v58 }
  0x9c   : > { %v2257_v61 = vpop.permute.xlu1 %641 }
  0x9d   : > { %v637_v60 = vpop.permute.xlu0 %636 }
  0x9e   : > { %v768_v52 = vmul.f32 %v2262_v0, %v637_v60 }
  0xa0   : > { %v652_v63 = vpop.permute.xlu1 %651 }
  0xa1   : > { %v647_v62 = vpop.permute.xlu0 %646  ;;  %v771_v35 = vmul.f32 %v2262_v0, %v652_v63 }
  0xa2   : > { %v770_v54 = vmul.f32 %v2262_v0, %v647_v62 }
  0xa4   : > { %v2269_v6 = vpop.permute.xlu1 %661 }
  0xa5   : > { %v2267_v5 = vpop.permute.xlu0 %656 }
  0xa8   : > { %v672_v21 = vpop.permute.xlu1 %671 }
  0xa9   : > { %v667_v17 = vpop.permute.xlu0 %666 }
  0xac   : > { %v2287_v44 = vpop.permute.xlu1 %681 }
  0xad   : > { %v2285_v41 = vpop.permute.xlu0 %676 }
  0xb0   : > { %v692_v56 = vpop.permute.xlu1 %691 }
  0xb1   : > { %v687_v37 = vpop.permute.xlu0 %686 }
  0xee   : > { %v1760_v3 = vpop.f32.mrf.mxu0 }
  0xef   : > { %v883_v10 = vadd.f32 %v1760_v3, %v762_v2 }
  0xf0   : > { %v874_v8 = vpop.f32.mrf.mxu0 }
  0xf1   : > { %v875_v9 = vadd.f32 %v874_v8, %v760_v1  ;;  %v1010_v22 = vadd.f32 %v2275_v14, %v883_v10  ;;  %v769_v1 = vmul.f32 %v2262_v0, %v2257_v61 }
  0xf2   : > { %v1761_v12 = vpop.f32.mrf.mxu0 }
  0xf3   : > { %v886_v15 = vadd.f32 %v1761_v12, %v763_v4  ;;  %v1008_v20 = vadd.f32 %v2275_v14, %v875_v9  ;;  %v1042_v33 = vmax.f32 %v1010_v22, 0.0  ;;  %v772_v12 = vmul.f32 %v2262_v0, %v2267_v5 }
  0xf4   : > { %v877_v16 = vpop.f32.mrf.mxu0  ;;  %v773_v5 = vmul.f32 %v2262_v0, %v2269_v6 }
  0xf5   : > { %v1011_v18 = vadd.f32 %v2275_v14, %v886_v15  ;;  %v878_v19 = vadd.f32 %v877_v16, %v761_v13  ;;  %v1040_v31 = vmax.f32 %v1008_v20, 0.0  ;;  %v697_v13 = vpop.permute.xlu0 %696  ;;  %v774_v15 = vmul.f32 %v2262_v0, %v667_v17  ;;  %v2305_v16 = vpop.permute.xlu1 %701 }
  0xf6   : > { %v1764_v23 = vpop.f32.mrf.mxu0  ;;  %v775_v20 = vmul.f32 %v2262_v0, %v672_v21 }
  0xf7   : > { %v1009_v25 = vadd.f32 %v2275_v14, %v878_v19  ;;  %v1043_v27 = vmax.f32 %v1011_v18, 0.0  ;;  %v899_v34 = vadd.f32 %v1764_v23, %v766_v26 }
  0xf8   : > { %v890_v28 = vpop.f32.mrf.mxu0 }
  0xf9   : > { %v891_v30 = vadd.f32 %v890_v28, %v764_v24  ;;  %v1041_v32 = vmax.f32 %v1009_v25, 0.0  ;;  %v1073_v46 = vpack.c.bf16 %v1043_v27, %v1042_v33  ;;  %v1014_v50 = vadd.f32 %v2275_v14, %v899_v34  ;;  %v707_v17 = vpop.permute.xlu0 %706  ;;  %v712_v21 = vpop.permute.xlu1 %711 }
  0xfa   : > { %v1765_v39 = vpop.f32.mrf.mxu0 }
  0xfb   : > { %v902_v42 = vadd.f32 %v1765_v39, %v767_v29  ;;  %v1072_v43 = vpack.c.bf16 %v1041_v32, %v1040_v31  ;;  %v1012_v47 = vadd.f32 %v2275_v14, %v891_v30  ;;  %v1046_v57 = vmax.f32 %v1014_v50, 0.0 }
  0xfc   : > { %v893_v45 = vpop.f32.mrf.mxu0 }
  0xfd   : > { %v1015_v48 = vadd.f32 %v2275_v14, %v902_v42  ;;  %v894_v49 = vadd.f32 %v893_v45, %v765_v40  ;;  %1806 = vmatprep.mubr.bf16.mxu1 %v1072_v43  ;;  %v1044_v11 = vmax.f32 %v1012_v47, 0.0  ;;  %v776_v42 = vmul.f32 %v2262_v0, %v2285_v41 }
  0xfe   : > { %v1768_v51 = vpop.f32.mrf.mxu0  ;;  %1807 = vmatmul.mubr.bf16.vlgmr.msra.gmra.mxu1 %v1073_v46  ;;  %v778_v43 = vmul.f32 %v2262_v0, %v687_v37  ;;  %v779_v47 = vmul.f32 %v2262_v0, %v692_v56 }
  0xff   : > { %v1013_v53 = vadd.f32 %v2275_v14, %v894_v49  ;;  %v1047_v7 = vmax.f32 %v1015_v48, 0.0  ;;  %v915_v58 = vadd.f32 %v1768_v51, %v770_v54  ;;  %v777_v54 = vmul.f32 %v2262_v0, %v2287_v44 }
 0x100   : > { %v906_v36 = vpop.f32.mrf.mxu0 }
 0x101   : > { %v1045_v38 = vmax.f32 %v1013_v53, 0.0  ;;  %v907_v55 = vadd.f32 %v906_v36, %v768_v52  ;;  %v1075_v4 = vpack.c.bf16 %v1047_v7, %v1046_v57  ;;  %v1018_v9 = vadd.f32 %v2275_v14, %v915_v58  ;;  %v717_v7 = vpop.permute.xlu0 %716 }
 0x102   : > { %v1769_v59 = vpop.f32.mrf.mxu0 }
 0x103   : > { %v918_v60 = vadd.f32 %v1769_v59, %v771_v35  ;;  %v1074_v2 = vpack.c.bf16 %v1045_v38, %v1044_v11  ;;  %v1016_v62 = vadd.f32 %v2275_v14, %v907_v55  ;;  %v1050_v25 = vmax.f32 %v1018_v9, 0.0  ;;  %v722_v35 = vpop.permute.xlu1 %721 }
 0x104   : > { %v909_v3 = vpop.f32.mrf.mxu0  ;;  %v780_v59 = vmul.f32 %v2262_v0, %v697_v13 }
 0x105   : > { %v1019_v8 = vadd.f32 %v2275_v14, %v918_v60  ;;  %v910_v63 = vadd.f32 %v909_v3, %v769_v1  ;;  %1810 = vmatprep.mubr.bf16.mxu1 %v1074_v2  ;;  %v1048_v22 = vmax.f32 %v1016_v62, 0.0  ;;  %v782_v1 = vmul.f32 %v2262_v0, %v707_v17 }
 0x106   : > { %v1772_v10 = vpop.f32.mrf.mxu0  ;;  %1811 = vmatmul.mubr.bf16.gmra.mxu1 %v1075_v4  ;;  %v783_v3 = vmul.f32 %v2262_v0, %v712_v21  ;;  %v727_v4 = vpop.permute.xlu0 %726 }
 0x107   : > { %v1017_v61 = vadd.f32 %v2275_v14, %v910_v63  ;;  %v1051_v18 = vmax.f32 %v1019_v8, 0.0  ;;  %v931_v26 = vadd.f32 %v1772_v10, %v774_v15  ;;  %v732_v9 = vpop.permute.xlu1 %731  ;;  %v781_v15 = vmul.f32 %v2262_v0, %v2305_v16 }
 0x108   : > { %v922_v19 = vpop.f32.mrf.mxu0  ;;  %v786_v16 = vmul.f32 %v2262_v0, %v727_v4  ;;  %v787_v17 = vmul.f32 %v2262_v0, %v732_v9 }
 0x109   : > { %v1049_v23 = vmax.f32 %v1017_v61, 0.0  ;;  %v923_v24 = vadd.f32 %v922_v19, %v772_v12  ;;  %v1077_v31 = vpack.c.bf16 %v1051_v18, %v1050_v25  ;;  %v1022_v39 = vadd.f32 %v2275_v14, %v931_v26 }
 0x10a   : > { %v1773_v27 = vpop.f32.mrf.mxu0 }
 0x10b   : > { %v934_v28 = vadd.f32 %v1773_v27, %v775_v20  ;;  %v1076_v29 = vpack.c.bf16 %v1049_v23, %v1048_v22  ;;  %v1020_v32 = vadd.f32 %v2275_v14, %v923_v24  ;;  %v1054_v51 = vmax.f32 %v1022_v39, 0.0 }
 0x10c   : > { %v925_v30 = vpop.f32.mrf.mxu0  ;;  %v784_v27 = vmul.f32 %v2262_v0, %v717_v7 }
 0x10d   : > { %v1023_v33 = vadd.f32 %v2275_v14, %v934_v28  ;;  %v926_v34 = vadd.f32 %v925_v30, %v773_v5  ;;  %1814 = vmatprep.mubr.bf16.mxu1 %v1076_v29  ;;  %v1052_v48 = vmax.f32 %v1020_v32, 0.0  ;;  %v737_v5 = vpop.permute.xlu0 %736  ;;  %v742_v29 = vpop.permute.xlu1 %741 }
 0x10e   : > { %v1776_v40 = vpop.f32.mrf.mxu0  ;;  %1815 = vmatmul.mubr.bf16.gmra.mxu1 %v1077_v31 }
 0x10f   : > { %v1021_v6 = vadd.f32 %v2275_v14, %v926_v34  ;;  %v1055_v45 = vmax.f32 %v1023_v33, 0.0  ;;  %v947_v52 = vadd.f32 %v1776_v40, %v778_v43 }
 0x110   : > { %v938_v46 = vpop.f32.mrf.mxu0 }
 0x111   : > { %v1053_v49 = vmax.f32 %v1021_v6, 0.0  ;;  %v939_v50 = vadd.f32 %v938_v46, %v776_v42  ;;  %v1079_v38 = vpack.c.bf16 %v1055_v45, %v1054_v51  ;;  %v1026_v57 = vadd.f32 %v2275_v14, %v947_v52  ;;  %v752_v51 = vpop.permute.xlu1 %751 }
 0x112   : > { %v1777_v53 = vpop.f32.mrf.mxu0  ;;  %v785_v42 = vmul.f32 %v2262_v0, %v722_v35 }
 0x113   : > { %v950_v36 = vadd.f32 %v1777_v53, %v779_v47  ;;  %v1078_v41 = vpack.c.bf16 %v1053_v49, %v1052_v48  ;;  %v1024_v37 = vadd.f32 %v2275_v14, %v939_v50  ;;  %v1058_v10 = vmax.f32 %v1026_v57, 0.0  ;;  %v747_v47 = vpop.permute.xlu0 %746 }
 0x114   : > { %v941_v11 = vpop.f32.mrf.mxu0 }
 0x115   : > { %v1027_v55 = vadd.f32 %v2275_v14, %v950_v36  ;;  %v942_v56 = vadd.f32 %v941_v11, %v777_v54  ;;  %1818 = vmatprep.mubr.bf16.mxu1 %v1078_v41  ;;  %v1056_v62 = vmax.f32 %v1024_v37, 0.0  ;;  %v788_v54 = vmul.f32 %v2262_v0, %v737_v5 }
 0x116   : > { %v1780_v58 = vpop.f32.mrf.mxu0  ;;  %1819 = vmatmul.mubr.bf16.gmra.mxu1 %v1079_v38  ;;  %v790_v36 = vmul.f32 %v2262_v0, %v747_v47  ;;  %v791_v11 = vmul.f32 %v2262_v0, %v752_v51 }
 0x117   : > { %v1025_v44 = vadd.f32 %v2275_v14, %v942_v56  ;;  %v1059_v60 = vmax.f32 %v1027_v55, 0.0  ;;  %v963_v12 = vadd.f32 %v1780_v58, %v782_v1 }
 0x118   : > { %v954_v2 = vpop.f32.mrf.mxu0 }
 0x119   : > { %v1057_v8 = vmax.f32 %v1025_v44, 0.0  ;;  %v955_v63 = vadd.f32 %v954_v2, %v780_v59  ;;  %v1081_v20 = vpack.c.bf16 %v1059_v60, %v1058_v10  ;;  %v1030_v25 = vadd.f32 %v2275_v14, %v963_v12 }
 0x11a   : > { %v1781_v61 = vpop.f32.mrf.mxu0  ;;  %v789_v59 = vmul.f32 %v2262_v0, %v742_v29 }
 0x11b   : > { %v966_v13 = vadd.f32 %v1781_v61, %v783_v3  ;;  %v1080_v18 = vpack.c.bf16 %v1057_v8, %v1056_v62  ;;  %v1028_v22 = vadd.f32 %v2275_v14, %v955_v63  ;;  %v1062_v21 = vmax.f32 %v1030_v25, 0.0 }
 0x11c   : > { %v957_v19 = vpop.f32.mrf.mxu0 }
 0x11d   : > { %v1031_v23 = vadd.f32 %v2275_v14, %v966_v13  ;;  %v958_v24 = vadd.f32 %v957_v19, %v781_v15  ;;  %1822 = vmatprep.mubr.bf16.mxu1 %v1080_v18  ;;  %v1060_v32 = vmax.f32 %v1028_v22, 0.0  ;;  %v2352_v13 = vld [vmem:[%s2538_s7] ss:$0 sm:$0xff] }
 0x11e   : > { %v1784_v26 = vpop.f32.mrf.mxu0  ;;  %1823 = vmatmul.mubr.bf16.gmra.mxu1 %v1081_v20 }
 0x11f   : > { %v1029_v28 = vadd.f32 %v2275_v14, %v958_v24  ;;  %v1063_v30 = vmax.f32 %v1031_v23, 0.0  ;;  %v979_v39 = vadd.f32 %v1784_v26, %v786_v16 }
 0x120   : > { %v970_v31 = vpop.f32.mrf.mxu0 }
 0x121   : > { %v1061_v33 = vmax.f32 %v1029_v28, 0.0  ;;  %v971_v34 = vadd.f32 %v970_v31, %v784_v27  ;;  %v1083_v46 = vpack.c.bf16 %v1063_v30, %v1062_v21  ;;  %v1034_v52 = vadd.f32 %v2275_v14, %v979_v39 }
 0x122   : > { %v1785_v40 = vpop.f32.mrf.mxu0 }
 0x123   : > { %v982_v6 = vadd.f32 %v1785_v40, %v787_v17  ;;  %v1082_v43 = vpack.c.bf16 %v1061_v33, %v1060_v32  ;;  %v1032_v48 = vadd.f32 %v2275_v14, %v971_v34  ;;  %v1066_v56 = vmax.f32 %v1034_v52, 0.0 }
 0x124   : > { %v973_v45 = vpop.f32.mrf.mxu0 }
 0x125   : > { %v1035_v49 = vadd.f32 %v2275_v14, %v982_v6  ;;  %v974_v50 = vadd.f32 %v973_v45, %v785_v42  ;;  %1826 = vmatprep.mubr.bf16.mxu1 %v1082_v43  ;;  %v1064_v38 = vmax.f32 %v1032_v48, 0.0 }
 0x126   : > { %v1788_v53 = vpop.f32.mrf.mxu0  ;;  %1827 = vmatmul.mubr.bf16.gmra.mxu1 %v1083_v46 }
 0x127   : > { %v1033_v7 = vadd.f32 %v2275_v14, %v974_v50  ;;  %v1067_v41 = vmax.f32 %v1035_v49, 0.0  ;;  %v995_v57 = vadd.f32 %v1788_v53, %v790_v36 }
 0x128   : > { %v986_v35 = vpop.f32.mrf.mxu0 }
 0x129   : > { %v1065_v37 = vmax.f32 %v1033_v7, 0.0  ;;  %v987_v55 = vadd.f32 %v986_v35, %v788_v54  ;;  %v1085_v2 = vpack.c.bf16 %v1067_v41, %v1066_v56  ;;  %v1038_v8 = vadd.f32 %v2275_v14, %v995_v57 }
 0x12a   : > { %v1789_v58 = vpop.f32.mrf.mxu0 }
 0x12b   : > { %v998_v44 = vadd.f32 %v1789_v58, %v791_v11  ;;  %v1084_v1 = vpack.c.bf16 %v1065_v37, %v1064_v38  ;;  %v1036_v3 = vadd.f32 %v2275_v14, %v987_v55  ;;  %v1070_v61 = vmax.f32 %v1038_v8, 0.0 }
 0x12c   : > { %v989_v60 = vpop.f32.mrf.mxu0 }
 0x12d   : > { %v1039_v4 = vadd.f32 %v2275_v14, %v998_v44  ;;  %v990_v62 = vadd.f32 %v989_v60, %v789_v59  ;;  %1830 = vmatprep.mubr.bf16.mxu1 %v1084_v1  ;;  %v1068_v10 = vmax.f32 %v1036_v3, 0.0 }
 0x12e   : > { %1831 = vmatmul.mubr.bf16.gmra.mxu1 %v1085_v2 }
 0x12f   : > { %v1037_v63 = vadd.f32 %v2275_v14, %v990_v62  ;;  %v1071_v9 = vmax.f32 %v1039_v4, 0.0  ;;  %v2358_v14 = vld [vmem:[%s2539_s8] ss:$0 sm:$0xff] }
 0x131   : > { %v1069_v12 = vmax.f32 %v1037_v63, 0.0  ;;  %v1087_v15 = vpack.c.bf16 %v1071_v9, %v1070_v61 }
 0x133   : > { %v1086_v0 = vpack.c.bf16 %v1069_v12, %v1068_v10 }
 0x135   : > { %1834 = vmatprep.mubr.bf16.mxu1 %v1086_v0 }
 0x136   : > { %1835 = vmatmul.mubr.bf16.gmra.mxu1 %v1087_v15 }
 0x1be   : > { %v1808_v18 = vpop.f32.mrf.mxu1 }
 0x1bf   : > { %v1202_v19 = vadd.f32 %v1808_v18, %v2352_v13 }
 0x1c0   : > { %v1193_v20 = vpop.f32.mrf.mxu1 }
 0x1c1   : > { %v1322_v22 = vmax.f32 %v1202_v19, 0.0  ;;  %v1194_v23 = vadd.f32 %v2352_v13, %v1193_v20 }
 0x1c2   : > { %v1809_v24 = vpop.f32.mrf.mxu1 }
 0x1c3   : > { %v1320_v25 = vmax.f32 %v1194_v23, 0.0  ;;  %v1205_v26 = vadd.f32 %v1809_v24, %v2352_v13  ;;  %v1361_v27 = vmul.f32 %v2358_v14, %v1322_v22 }
 0x1c4   : > { %v1196_v5 = vpop.f32.mrf.mxu1 }
 0x1c5   : > { %v1197_v28 = vadd.f32 %v2352_v13, %v1196_v5  ;;  %1395 = vadd.xlane.f32.xlu0 %v1361_v27  ;;  %v1323_v29 = vmax.f32 %v1205_v26, 0.0  ;;  %v1359_v17 = vmul.f32 %v2358_v14, %v1320_v25 }
 0x1c6   : > { %v1812_v16 = vpop.f32.mrf.mxu1 }
 0x1c7   : > { %v1321_v30 = vmax.f32 %v1197_v28, 0.0  ;;  %v1218_v31 = vadd.f32 %v1812_v16, %v2352_v13  ;;  %v1362_v42 = vmul.f32 %v2358_v14, %v1323_v29 }
 0x1c8   : > { %v1209_v32 = vpop.f32.mrf.mxu1 }
 0x1c9   : > { %v1326_v33 = vmax.f32 %v1218_v31, 0.0  ;;  %v1210_v34 = vadd.f32 %v2352_v13, %v1209_v32  ;;  %1391 = vadd.xlane.f32.xlu0 %v1359_v17  ;;  %v1360_v21 = vmul.f32 %v2358_v14, %v1321_v30 }
 0x1ca   : > { %v1813_v39 = vpop.f32.mrf.mxu1 }
 0x1cb   : > { %v1221_v40 = vadd.f32 %v1813_v39, %v2352_v13  ;;  %1393 = vadd.xlane.f32.xlu1 %v1360_v21  ;;  %v1324_v43 = vmax.f32 %v1210_v34, 0.0  ;;  %v1365_v47 = vmul.f32 %v2358_v14, %v1326_v33 }
 0x1cc   : > { %v1212_v6 = vpop.f32.mrf.mxu1 }
 0x1cd   : > { %v1327_v45 = vmax.f32 %v1221_v40, 0.0  ;;  %v1213_v46 = vadd.f32 %v2352_v13, %v1212_v6  ;;  %1397 = vadd.xlane.f32.xlu0 %v1362_v42  ;;  %v1363_v7 = vmul.f32 %v2358_v14, %v1324_v43 }
 0x1ce   : > { %v1816_v48 = vpop.f32.mrf.mxu1 }
 0x1cf   : > { %v1325_v49 = vmax.f32 %v1213_v46, 0.0  ;;  %v1234_v50 = vadd.f32 %v1816_v48, %v2352_v13  ;;  %1403 = vadd.xlane.f32.xlu1 %v1365_v47  ;;  %v1366_v51 = vmul.f32 %v2358_v14, %v1327_v45 }
 0x1d0   : > { %v1225_v52 = vpop.f32.mrf.mxu1 }
 0x1d1   : > { %v1330_v53 = vmax.f32 %v1234_v50, 0.0  ;;  %v1226_v54 = vadd.f32 %v2352_v13, %v1225_v52  ;;  %1405 = vadd.xlane.f32.xlu0 %v1366_v51  ;;  %v1364_v35 = vmul.f32 %v2358_v14, %v1325_v49 }
 0x1d2   : > { %v1817_v36 = vpop.f32.mrf.mxu1 }
 0x1d3   : > { %v1237_v41 = vadd.f32 %v1817_v36, %v2352_v13  ;;  %1399 = vadd.xlane.f32.xlu1 %v1363_v7  ;;  %v1328_v38 = vmax.f32 %v1226_v54, 0.0  ;;  %v1369_v56 = vmul.f32 %v2358_v14, %v1330_v53 }
 0x1d4   : > { %v1228_v11 = vpop.f32.mrf.mxu1 }
 0x1d5   : > { %v1331_v37 = vmax.f32 %v1237_v41, 0.0  ;;  %v1229_v55 = vadd.f32 %v2352_v13, %v1228_v11  ;;  %1401 = vadd.xlane.f32.xlu0 %v1364_v35  ;;  %v1367_v3 = vmul.f32 %v2358_v14, %v1328_v38 }
 0x1d6   : > { %v1820_v57 = vpop.f32.mrf.mxu1 }
 0x1d7   : > { %v1329_v58 = vmax.f32 %v1229_v55, 0.0  ;;  %v1250_v59 = vadd.f32 %v1820_v57, %v2352_v13  ;;  %1411 = vadd.xlane.f32.xlu1 %v1369_v56  ;;  %v1370_v44 = vmul.f32 %v2358_v14, %v1331_v37 }
 0x1d8   : > { %v1241_v1 = vpop.f32.mrf.mxu1 }
 0x1d9   : > { %v1334_v60 = vmax.f32 %v1250_v59, 0.0  ;;  %v1242_v2 = vadd.f32 %v2352_v13, %v1241_v1  ;;  %1413 = vadd.xlane.f32.xlu0 %v1370_v44  ;;  %v1368_v8 = vmul.f32 %v2358_v14, %v1329_v58 }
 0x1da   : > { %v1821_v4 = vpop.f32.mrf.mxu1 }
 0x1db   : > { %v1253_v62 = vadd.f32 %v1821_v4, %v2352_v13  ;;  %1407 = vadd.xlane.f32.xlu1 %v1367_v3  ;;  %v1332_v9 = vmax.f32 %v1242_v2, 0.0  ;;  %v1373_v61 = vmul.f32 %v2358_v14, %v1334_v60 }
 0x1dc   : > { %v1244_v63 = vpop.f32.mrf.mxu1 }
 0x1dd   : > { %v1335_v10 = vmax.f32 %v1253_v62, 0.0  ;;  %v1245_v12 = vadd.f32 %v2352_v13, %v1244_v63  ;;  %1409 = vadd.xlane.f32.xlu0 %v1368_v8  ;;  %v1371_v24 = vmul.f32 %v2358_v14, %v1332_v9 }
 0x1de   : > { %v1824_v0 = vpop.f32.mrf.mxu1 }
 0x1df   : > { %v1333_v15 = vmax.f32 %v1245_v12, 0.0  ;;  %v1266_v18 = vadd.f32 %v1824_v0, %v2352_v13  ;;  %1419 = vadd.xlane.f32.xlu1 %v1373_v61  ;;  %v1374_v19 = vmul.f32 %v2358_v14, %v1335_v10 }
 0x1e0   : > { %v1257_v20 = vpop.f32.mrf.mxu1 }
 0x1e1   : > { %v1338_v22 = vmax.f32 %v1266_v18, 0.0  ;;  %v1258_v23 = vadd.f32 %v2352_v13, %v1257_v20  ;;  %1421 = vadd.xlane.f32.xlu0 %v1374_v19  ;;  %v1372_v27 = vmul.f32 %v2358_v14, %v1333_v15 }
 0x1e2   : > { %v1825_v25 = vpop.f32.mrf.mxu1 }
 0x1e3   : > { %v1269_v26 = vadd.f32 %v1825_v25, %v2352_v13  ;;  %1415 = vadd.xlane.f32.xlu1 %v1371_v24  ;;  %v1336_v28 = vmax.f32 %v1258_v23, 0.0  ;;  %v1377_v30 = vmul.f32 %v2358_v14, %v1338_v22  ;;  %v2423_v23 = vld [vmem:[#allocation2] ss:$0 sm:$0xff] }
 0x1e4   : > { %v1260_v5 = vpop.f32.mrf.mxu1 }
 0x1e5   : > { %v1339_v16 = vmax.f32 %v1269_v26, 0.0  ;;  %v1261_v29 = vadd.f32 %v2352_v13, %v1260_v5  ;;  %1417 = vadd.xlane.f32.xlu0 %v1372_v27  ;;  %v1375_v40 = vmul.f32 %v2358_v14, %v1336_v28 }
 0x1e6   : > { %v1828_v31 = vpop.f32.mrf.mxu1 }
 0x1e7   : > { %v1337_v17 = vmax.f32 %v1261_v29, 0.0  ;;  %v1282_v32 = vadd.f32 %v1828_v31, %v2352_v13  ;;  %1427 = vadd.xlane.f32.xlu1 %v1377_v30  ;;  %v1378_v33 = vmul.f32 %v2358_v14, %v1339_v16 }
 0x1e8   : > { %v1273_v34 = vpop.f32.mrf.mxu1 }
 0x1e9   : > { %v1342_v21 = vmax.f32 %v1282_v32, 0.0  ;;  %v1274_v39 = vadd.f32 %v2352_v13, %v1273_v34  ;;  %1429 = vadd.xlane.f32.xlu0 %v1378_v33  ;;  %v1376_v43 = vmul.f32 %v2358_v14, %v1337_v17 }
 0x1ea   : > { %v1829_v42 = vpop.f32.mrf.mxu1 }
 0x1eb   : > { %v1285_v6 = vadd.f32 %v1829_v42, %v2352_v13  ;;  %1423 = vadd.xlane.f32.xlu1 %v1375_v40  ;;  %v1340_v46 = vmax.f32 %v1274_v39, 0.0  ;;  %v1381_v49 = vmul.f32 %v2358_v14, %v1342_v21 }
 0x1ec   : > { %v1276_v45 = vpop.f32.mrf.mxu1 }
 0x1ed   : > { %v1343_v47 = vmax.f32 %v1285_v6, 0.0  ;;  %v1277_v48 = vadd.f32 %v2352_v13, %v1276_v45  ;;  %1425 = vadd.xlane.f32.xlu0 %v1376_v43  ;;  %v1379_v41 = vmul.f32 %v2358_v14, %v1340_v46 }
 0x1ee   : > { %v1832_v50 = vpop.f32.mrf.mxu1 }
 0x1ef   : > { %v1341_v51 = vmax.f32 %v1277_v48, 0.0  ;;  %v1298_v52 = vadd.f32 %v1832_v50, %v2352_v13  ;;  %1435 = vadd.xlane.f32.xlu1 %v1381_v49  ;;  %v1382_v53 = vmul.f32 %v2358_v14, %v1343_v47 }
 0x1f0   : > { %v1289_v54 = vpop.f32.mrf.mxu1 }
 0x1f1   : > { %v1346_v7 = vmax.f32 %v1298_v52, 0.0  ;;  %v1290_v36 = vadd.f32 %v2352_v13, %v1289_v54  ;;  %1437 = vadd.xlane.f32.xlu0 %v1382_v53  ;;  %v1380_v38 = vmul.f32 %v2358_v14, %v1341_v51 }
 0x1f2   : > { %v1833_v35 = vpop.f32.mrf.mxu1 }
 0x1f3   : > { %v1301_v11 = vadd.f32 %v1833_v35, %v2352_v13  ;;  %1431 = vadd.xlane.f32.xlu1 %v1379_v41  ;;  %v1344_v55 = vmax.f32 %v1290_v36, 0.0  ;;  %v1385_v58 = vmul.f32 %v2358_v14, %v1346_v7 }
 0x1f4   : > { %v1292_v37 = vpop.f32.mrf.mxu1 }
 0x1f5   : > { %v1347_v56 = vmax.f32 %v1301_v11, 0.0  ;;  %v1293_v57 = vadd.f32 %v2352_v13, %v1292_v37  ;;  %1433 = vadd.xlane.f32.xlu0 %v1380_v38  ;;  %v1383_v4 = vmul.f32 %v2358_v14, %v1344_v55 }
 0x1f6   : > { %v1836_v59 = vpop.f32.mrf.mxu1 }
 0x1f7   : > { %v1345_v44 = vmax.f32 %v1293_v57, 0.0  ;;  %1443 = vadd.xlane.f32.xlu1 %v1385_v58  ;;  %v1386_v1 = vmul.f32 %v2358_v14, %v1347_v56  ;;  %v1314_v2 = vadd.f32 %v1836_v59, %v2352_v13 }
 0x1f8   : > { %v1305_v60 = vpop.f32.mrf.mxu1 }
 0x1f9   : > { %v1306_v3 = vadd.f32 %v2352_v13, %v1305_v60  ;;  %1445 = vadd.xlane.f32.xlu0 %v1386_v1  ;;  %v1384_v9 = vmul.f32 %v2358_v14, %v1345_v44  ;;  %v1350_v12 = vmax.f32 %v1314_v2, 0.0 }
 0x1fa   : > { %v1837_v62 = vpop.f32.mrf.mxu1 }
 0x1fb   : > { %v1348_v8 = vmax.f32 %v1306_v3, 0.0  ;;  %v1317_v63 = vadd.f32 %v1837_v62, %v2352_v13  ;;  %1439 = vadd.xlane.f32.xlu1 %v1383_v4  ;;  %v1389_v20 = vmul.f32 %v2358_v14, %v1350_v12 }
 0x1fc   : > { %v1308_v10 = vpop.f32.mrf.mxu1 }
 0x1fd   : > { %v1351_v61 = vmax.f32 %v1317_v63, 0.0  ;;  %v1309_v0 = vadd.f32 %v2352_v13, %v1308_v10  ;;  %1441 = vadd.xlane.f32.xlu0 %v1384_v9  ;;  %v1387_v15 = vmul.f32 %v2358_v14, %v1348_v8 }
 0x1ff   : > { %v1349_v18 = vmax.f32 %v1309_v0, 0.0  ;;  %1447 = vadd.xlane.f32.xlu1 %v1387_v15  ;;  %v1390_v19 = vmul.f32 %v2358_v14, %v1351_v61 }
 0x201   : > { %v1388_v22 = vmul.f32 %v2358_v14, %v1349_v18 }
 0x203   : > { %1451 = vadd.xlane.f32.xlu1 %v1389_v20  ;;  %1449 = vadd.xlane.f32.xlu0 %v1388_v22 }
 0x207   : > { %1453 = vadd.xlane.f32.xlu0 %v1390_v19 }
 0x24e   : > { %v1396_v13 = vpop.xlane.xlu0 %1395 }
 0x24f   : > { %v1464_v14 = vadd.f32 %v2423_v23, %v1396_v13 }
 0x251   : > { %1497 = vst.msk [vmem:[%s2430_s27 + $0x10] sm:$0xff] %vm1494_vm5, %v1464_v14 }
 0x252   : > { %v1392_v24 = vpop.xlane.xlu0 %1391 }
 0x253   : > { %v1462_v25 = vadd.f32 %v2423_v23, %v1392_v24 }
 0x254   : > { %v1394_v26 = vpop.xlane.xlu1 %1393 }
 0x255   : > { %1495 = vst.msk [vmem:[%s2430_s27] sm:$0xff] %vm1494_vm5, %v1462_v25  ;;  %v1463_v27 = vadd.f32 %v2423_v23, %v1394_v26 }
 0x256   : > { %v1398_v5 = vpop.xlane.xlu0 %1397 }
 0x257   : > { %1496 = vst.msk [vmem:[%s2430_s27 + $0x8] sm:$0xff] %vm1494_vm5, %v1463_v27  ;;  %v1465_v28 = vadd.f32 %v2423_v23, %v1398_v5 }
 0x258   : > { %v1404_v16 = vpop.xlane.xlu1 %1403 }
 0x259   : > { %1498 = vst.msk [vmem:[%s2430_s27 + $0x18] sm:$0xff] %vm1494_vm5, %v1465_v28  ;;  %v1468_v29 = vadd.f32 %v2423_v23, %v1404_v16 }
 0x25a   : > { %v1406_v30 = vpop.xlane.xlu0 %1405 }
 0x25b   : > { %1501 = vst.msk [vmem:[%s2430_s27 + $0x30] sm:$0xff] %vm1494_vm5, %v1468_v29  ;;  %v1469_v31 = vadd.f32 %v2423_v23, %v1406_v30 }
 0x25c   : > { %v1400_v17 = vpop.xlane.xlu1 %1399 }
 0x25d   : > { %1502 = vst.msk [vmem:[%s2430_s27 + $0x38] sm:$0xff] %vm1494_vm5, %v1469_v31  ;;  %v1466_v32 = vadd.f32 %v2423_v23, %v1400_v17 }
 0x25e   : > { %v1402_v33 = vpop.xlane.xlu0 %1401 }
 0x25f   : > { %1499 = vst.msk [vmem:[%s2430_s27 + $0x20] sm:$0xff] %vm1494_vm5, %v1466_v32  ;;  %v1467_v34 = vadd.f32 %v2423_v23, %v1402_v33 }
 0x260   : > { %v1412_v21 = vpop.xlane.xlu1 %1411 }
 0x261   : > { %1500 = vst.msk [vmem:[%s2430_s27 + $0x28] sm:$0xff] %vm1494_vm5, %v1467_v34  ;;  %v1472_v39 = vadd.f32 %v2423_v23, %v1412_v21 }
 0x262   : > { %v1414_v40 = vpop.xlane.xlu0 %1413 }
 0x263   : > { %1505 = vst.msk [vmem:[%s2430_s27 + $0x50] sm:$0xff] %vm1494_vm5, %v1472_v39  ;;  %v1473_v42 = vadd.f32 %v2423_v23, %v1414_v40 }
 0x264   : > { %v1408_v6 = vpop.xlane.xlu1 %1407 }
 0x265   : > { %1506 = vst.msk [vmem:[%s2430_s27 + $0x58] sm:$0xff] %vm1494_vm5, %v1473_v42  ;;  %v1470_v43 = vadd.f32 %v2423_v23, %v1408_v6 }
 0x266   : > { %v1410_v45 = vpop.xlane.xlu0 %1409 }
 0x267   : > { %1503 = vst.msk [vmem:[%s2430_s27 + $0x40] sm:$0xff] %vm1494_vm5, %v1470_v43  ;;  %v1471_v46 = vadd.f32 %v2423_v23, %v1410_v45 }
 0x268   : > { %v1420_v47 = vpop.xlane.xlu1 %1419 }
 0x269   : > { %1504 = vst.msk [vmem:[%s2430_s27 + $0x48] sm:$0xff] %vm1494_vm5, %v1471_v46  ;;  %v1476_v48 = vadd.f32 %v2423_v23, %v1420_v47 }
 0x26a   : > { %v1422_v49 = vpop.xlane.xlu0 %1421 }
 0x26b   : > { %1509 = vst.msk [vmem:[%s2430_s27 + $0x70] sm:$0xff] %vm1494_vm5, %v1476_v48  ;;  %v1477_v50 = vadd.f32 %v2423_v23, %v1422_v49 }
 0x26c   : > { %v1416_v51 = vpop.xlane.xlu1 %1415 }
 0x26d   : > { %1510 = vst.msk [vmem:[%s2430_s27 + $0x78] sm:$0xff] %vm1494_vm5, %v1477_v50  ;;  %v1474_v52 = vadd.f32 %v2423_v23, %v1416_v51 }
 0x26e   : > { %v1418_v53 = vpop.xlane.xlu0 %1417 }
 0x26f   : > { %1507 = vst.msk [vmem:[%s2430_s27 + $0x60] sm:$0xff] %vm1494_vm5, %v1474_v52  ;;  %v1475_v54 = vadd.f32 %v2423_v23, %v1418_v53 }
 0x270   : > { %v1428_v7 = vpop.xlane.xlu1 %1427 }
 0x271   : > { %1508 = vst.msk [vmem:[%s2430_s27 + $0x68] sm:$0xff] %vm1494_vm5, %v1475_v54  ;;  %v1480_v36 = vadd.f32 %v2423_v23, %v1428_v7 }
 0x272   : > { %v1430_v41 = vpop.xlane.xlu0 %1429 }
 0x273   : > { %1513 = vst.msk [vmem:[%s2430_s27 + $0x90] sm:$0xff] %vm1494_vm5, %v1480_v36  ;;  %v1481_v35 = vadd.f32 %v2423_v23, %v1430_v41 }
 0x274   : > { %v1424_v11 = vpop.xlane.xlu1 %1423 }
 0x275   : > { %1514 = vst.msk [vmem:[%s2430_s27 + $0x98] sm:$0xff] %vm1494_vm5, %v1481_v35  ;;  %v1478_v38 = vadd.f32 %v2423_v23, %v1424_v11 }
 0x276   : > { %v1426_v37 = vpop.xlane.xlu0 %1425 }
 0x277   : > { %1511 = vst.msk [vmem:[%s2430_s27 + $0x80] sm:$0xff] %vm1494_vm5, %v1478_v38  ;;  %v1479_v55 = vadd.f32 %v2423_v23, %v1426_v37 }
 0x278   : > { %v1436_v56 = vpop.xlane.xlu1 %1435 }
 0x279   : > { %1512 = vst.msk [vmem:[%s2430_s27 + $0x88] sm:$0xff] %vm1494_vm5, %v1479_v55  ;;  %v1484_v57 = vadd.f32 %v2423_v23, %v1436_v56 }
 0x27a   : > { %v1438_v58 = vpop.xlane.xlu0 %1437 }
 0x27b   : > { %1517 = vst.msk [vmem:[%s2430_s27 + $0xb0] sm:$0xff] %vm1494_vm5, %v1484_v57  ;;  %v1485_v59 = vadd.f32 %v2423_v23, %v1438_v58 }
 0x27c   : > { %v1432_v44 = vpop.xlane.xlu1 %1431 }
 0x27d   : > { %1518 = vst.msk [vmem:[%s2430_s27 + $0xb8] sm:$0xff] %vm1494_vm5, %v1485_v59  ;;  %v1482_v1 = vadd.f32 %v2423_v23, %v1432_v44 }
 0x27e   : > { %v1434_v60 = vpop.xlane.xlu0 %1433 }
 0x27f   : > { %1515 = vst.msk [vmem:[%s2430_s27 + $0xa0] sm:$0xff] %vm1494_vm5, %v1482_v1  ;;  %v1483_v2 = vadd.f32 %v2423_v23, %v1434_v60 }
 0x280   : > { %v1444_v3 = vpop.xlane.xlu1 %1443 }
 0x281   : > { %1516 = vst.msk [vmem:[%s2430_s27 + $0xa8] sm:$0xff] %vm1494_vm5, %v1483_v2  ;;  %v1488_v4 = vadd.f32 %v2423_v23, %v1444_v3 }
 0x282   : > { %v1446_v62 = vpop.xlane.xlu0 %1445 }
 0x283   : > { %1521 = vst.msk [vmem:[%s2430_s27 + $0xd0] sm:$0xff] %vm1494_vm5, %v1488_v4  ;;  %v1489_v8 = vadd.f32 %v2423_v23, %v1446_v62 }
 0x284   : > { %v1440_v63 = vpop.xlane.xlu1 %1439 }
 0x285   : > { %1522 = vst.msk [vmem:[%s2430_s27 + $0xd8] sm:$0xff] %vm1494_vm5, %v1489_v8  ;;  %v1486_v9 = vadd.f32 %v2423_v23, %v1440_v63 }
 0x286   : > { %v1442_v10 = vpop.xlane.xlu0 %1441 }
 0x287   : > { %1519 = vst.msk [vmem:[%s2430_s27 + $0xc0] sm:$0xff] %vm1494_vm5, %v1486_v9  ;;  %v1487_v12 = vadd.f32 %v2423_v23, %v1442_v10 }
 0x288   : > { %v1448_v61 = vpop.xlane.xlu1 %1447 }
 0x289   : > { %1520 = vst.msk [vmem:[%s2430_s27 + $0xc8] sm:$0xff] %vm1494_vm5, %v1487_v12  ;;  %v1490_v0 = vadd.f32 %v2423_v23, %v1448_v61 }
 0x28b   : > { %1523 = vst.msk [vmem:[%s2430_s27 + $0xe0] sm:$0xff] %vm1494_vm5, %v1490_v0 }
 0x28c   : > { %v1452_v15 = vpop.xlane.xlu1 %1451  ;;  %v1450_v18 = vpop.xlane.xlu0 %1449 }
 0x28d   : > { %v1492_v19 = vadd.f32 %v2423_v23, %v1452_v15  ;;  %v1491_v20 = vadd.f32 %v2423_v23, %v1450_v18 }
 0x28f   : > { %1525 = vst.msk [vmem:[%s2430_s27 + $0xf0] sm:$0xff] %vm1494_vm5, %v1492_v19  ;;  %1524 = vst.msk [vmem:[%s2430_s27 + $0xe8] sm:$0xff] %vm1494_vm5, %v1491_v20 }
 0x290   : > { %v1454_v22 = vpop.xlane.xlu0 %1453 }
 0x291   : > { %v1493_v13 = vadd.f32 %v2423_v23, %v1454_v22 }
 0x293   : > { %1526 = vst.msk [vmem:[%s2430_s27 + $0xf8] sm:$0xff] %vm1494_vm5, %v1493_v13 }
 0x294 PF: > { %s22_s15 = sadd.s32 1, %s1872_s15  }
 0x295   : > { %p19_p5 = scmp.ge.s32.totalorder %s22_s15, 4  }
 0x297   :  { %21 = sbr.rel (!%p19_p5) target bundleno = 3 (0x3), region = 93 }

</bundles_post_ra>
